<compile_context>
chip_gen: v5e
topology: v5e:2x2
jax: 0.10.0
libtpu: 0.0.40
codegen_flags: <defaults>
</compile_context>

<pallas_src>
import functools

import jax
import jax.numpy as jnp
from jax.experimental import pallas as pl
from jax.experimental.pallas import tpu as pltpu

LANE = 128
SUBLANE = 8


def _round_up(x, m):
    return ((x + m - 1) // m) * m


def _nlinet_kernel(s1_ref,
                   w1_ref, b1_ref,
                   w2_ref, b2_ref,
                   w3_ref, b3_ref,
                   w4_ref, b4_ref,
                   w5_ref, b5_ref,
                   out_ref,
                   *, inv_t):
    # ---- encoder (placeholder): mean pooling over time as scaled sublane sum ----
    u = jnp.sum(s1_ref[...], axis=1) * inv_t                     # (TILE_B, D_pad)

    # ---- classifier MLP (Dropout layers are identity in eval mode) ----
    h = jnp.dot(u, w1_ref[...], preferred_element_type=jnp.float32) + b1_ref[...]
    h = jnp.dot(h, w2_ref[...], preferred_element_type=jnp.float32) + b2_ref[...]
    h = jnp.dot(h, w3_ref[...], preferred_element_type=jnp.float32) + b3_ref[...]
    h = jnp.maximum(h, 0.0)
    h = jnp.dot(h, w4_ref[...], preferred_element_type=jnp.float32) + b4_ref[...]
    out = jnp.dot(h, w5_ref[...], preferred_element_type=jnp.float32) + b5_ref[...]

    out_ref[...] = out.astype(out_ref.dtype)                     # lane-dense store


def nlinet_forward(s1, params):
    """s1: (B, T, D) float32; params: dict of W (in, out) and b (1, out)."""
    B, T, D = s1.shape
    fc = params["w1"].shape[1]
    n_classes = params["w5"].shape[1]

    d_pad = _round_up(D, LANE)
    fc_pad = _round_up(fc, LANE)
    nc_pad = _round_up(n_classes, LANE)

    tile_b = LANE if B >= LANE else _round_up(B, SUBLANE)
    b_pad = _round_up(B, tile_b)

    def pad2(a, rows, cols):
        return jnp.pad(a, ((0, rows - a.shape[0]), (0, cols - a.shape[1])))

    # Zero-pad once in the wrapper (padded rows/cols contribute exactly zero).
    s1_p = jnp.pad(s1, ((0, b_pad - B), (0, 0), (0, d_pad - D)))
    w1 = pad2(params["w1"], d_pad, fc_pad);   b1 = pad2(params["b1"], 1, fc_pad)
    w2 = pad2(params["w2"], fc_pad, fc_pad);  b2 = pad2(params["b2"], 1, fc_pad)
    w3 = pad2(params["w3"], fc_pad, fc_pad);  b3 = pad2(params["b3"], 1, fc_pad)
    w4 = pad2(params["w4"], fc_pad, fc_pad);  b4 = pad2(params["b4"], 1, fc_pad)
    w5 = pad2(params["w5"], fc_pad, nc_pad);  b5 = pad2(params["b5"], 1, nc_pad)

    # Weights/biases: constant index_map -> DMA'd once, resident across steps.
    def resident(shape):
        return pl.BlockSpec(shape, lambda i: (0, 0))

    in_specs = [
        pl.BlockSpec((tile_b, T, d_pad), lambda i: (i, 0, 0)),   # s1 tile
        resident((d_pad, fc_pad)),  resident((1, fc_pad)),        # w1, b1
        resident((fc_pad, fc_pad)), resident((1, fc_pad)),        # w2, b2
        resident((fc_pad, fc_pad)), resident((1, fc_pad)),        # w3, b3
        resident((fc_pad, fc_pad)), resident((1, fc_pad)),        # w4, b4
        resident((fc_pad, nc_pad)), resident((1, nc_pad)),        # w5, b5
    ]
    out_spec = pl.BlockSpec((tile_b, nc_pad), lambda i: (i, 0))

    kernel = functools.partial(_nlinet_kernel, inv_t=1.0 / T)

    out_padded = pl.pallas_call(
        kernel,
        out_shape=jax.ShapeDtypeStruct((b_pad, nc_pad), jnp.float32),
        grid=(b_pad // tile_b,),
        in_specs=in_specs,
        out_specs=out_spec,
        compiler_params=pltpu.CompilerParams(
            dimension_semantics=("parallel",)),
    )(s1_p, w1, b1, w2, b2, w3, b3, w4, b4, w5, b5)

    return out_padded[:B, :n_classes]


def init_params(key, enc_lstm_dim, fc_dim, n_classes):
    """Deterministic synthetic parameters.  Weights stored as (in, out)."""
    dims = [(enc_lstm_dim, fc_dim),
            (fc_dim, fc_dim),
            (fc_dim, fc_dim),
            (fc_dim, fc_dim),
            (fc_dim, n_classes)]
    params = {}
    for i, (din, dout) in enumerate(dims, start=1):
        key, kw, kb = jax.random.split(key, 3)
        scale = 1.0 / jnp.sqrt(jnp.float32(din))
        params[f"w{i}"] = jax.random.uniform(
            kw, (din, dout), jnp.float32, minval=-scale, maxval=scale)
        params[f"b{i}"] = jax.random.uniform(
            kb, (1, dout), jnp.float32, minval=-scale, maxval=scale)
    return params


def reference_forward(s1, params):
    """Pure-JAX reference for a sanity check."""
    u = jnp.mean(s1, axis=1)
    h = u @ params["w1"] + params["b1"]
    h = h @ params["w2"] + params["b2"]
    h = h @ params["w3"] + params["b3"]
    h = jnp.maximum(h, 0.0)
    h = h @ params["w4"] + params["b4"]
    return h @ params["w5"] + params["b5"]


if __name__ == "__main__":
    # small config consistent with the module
    batch = 8
    seq = 8
    enc_lstm_dim = 32   # config['enc_lstm_dim'] -> inputdim
    fc_dim = 64         # config['fc_dim']
    n_classes = 4       # config['n_classes']

    key = jax.random.PRNGKey(0)
    key, k_in = jax.random.split(key)

    s1 = jax.random.normal(k_in, (batch, seq, enc_lstm_dim), jnp.float32)
    params = init_params(key, enc_lstm_dim, fc_dim, n_classes)

    out = nlinet_forward(s1, params)
    out = jax.block_until_ready(out)

    ref = reference_forward(s1, params)
    assert out.shape == (batch, n_classes)
    assert jnp.allclose(out, ref, atol=1e-4, rtol=1e-4)

    print("KERNEL_OK")
</pallas_src>

<mosaic_0001>
module attributes {stable_mosaic.version = 11 : i64} {
  func.func @_nlinet_kernel(%arg0: i32, %arg1: memref<8x8x128xf32, #tpu.memory_space<vmem>>, %arg2: memref<128x128xf32, #tpu.memory_space<vmem>>, %arg3: memref<1x128xf32, #tpu.memory_space<vmem>>, %arg4: memref<128x128xf32, #tpu.memory_space<vmem>>, %arg5: memref<1x128xf32, #tpu.memory_space<vmem>>, %arg6: memref<128x128xf32, #tpu.memory_space<vmem>>, %arg7: memref<1x128xf32, #tpu.memory_space<vmem>>, %arg8: memref<128x128xf32, #tpu.memory_space<vmem>>, %arg9: memref<1x128xf32, #tpu.memory_space<vmem>>, %arg10: memref<128x128xf32, #tpu.memory_space<vmem>>, %arg11: memref<1x128xf32, #tpu.memory_space<vmem>>, %arg12: memref<8x128xf32, #tpu.memory_space<vmem>>) attributes {dimension_semantics = [#tpu.dimension_semantics<parallel>], iteration_bounds = array<i64: 1>, scalar_prefetch = 0 : i64, scratch_operands = 0 : i64, tpu.core_type = #tpu.core_type<tc>, window_params = [{transform_indices = @transform_0, window_bounds = array<i64: 8, 8, 128>}, {pipeline_mode = #tpu.pipeline_mode<synchronous>, transform_indices = @transform_1, window_bounds = array<i64: 128, 128>}, {pipeline_mode = #tpu.pipeline_mode<synchronous>, transform_indices = @transform_2, window_bounds = array<i64: 1, 128>}, {pipeline_mode = #tpu.pipeline_mode<synchronous>, transform_indices = @transform_3, window_bounds = array<i64: 128, 128>}, {pipeline_mode = #tpu.pipeline_mode<synchronous>, transform_indices = @transform_4, window_bounds = array<i64: 1, 128>}, {pipeline_mode = #tpu.pipeline_mode<synchronous>, transform_indices = @transform_5, window_bounds = array<i64: 128, 128>}, {pipeline_mode = #tpu.pipeline_mode<synchronous>, transform_indices = @transform_6, window_bounds = array<i64: 1, 128>}, {pipeline_mode = #tpu.pipeline_mode<synchronous>, transform_indices = @transform_7, window_bounds = array<i64: 128, 128>}, {pipeline_mode = #tpu.pipeline_mode<synchronous>, transform_indices = @transform_8, window_bounds = array<i64: 1, 128>}, {pipeline_mode = #tpu.pipeline_mode<synchronous>, transform_indices = @transform_9, window_bounds = array<i64: 128, 128>}, {pipeline_mode = #tpu.pipeline_mode<synchronous>, transform_indices = @transform_10, window_bounds = array<i64: 1, 128>}, {transform_indices = @transform_11, window_bounds = array<i64: 8, 128>}]} {
    %c0 = arith.constant 0 : index
    %c0_0 = arith.constant 0 : index
    %c0_1 = arith.constant 0 : index
    %0 = vector.load %arg1[%c0, %c0_0, %c0_1] : memref<8x8x128xf32, #tpu.memory_space<vmem>>, vector<8x8x128xf32>
    %cst = arith.constant dense<0.000000e+00> : vector<8x128xf32>
    %1 = vector.multi_reduction <add>, %0, %cst [1] : vector<8x8x128xf32> to vector<8x128xf32>
    %cst_2 = arith.constant 1.250000e-01 : f32
    %2 = vector.broadcast %cst_2 : f32 to vector<8x128xf32>
    %3 = arith.mulf %1, %2 : vector<8x128xf32>
    %c0_3 = arith.constant 0 : index
    %c0_4 = arith.constant 0 : index
    %4 = vector.load %arg2[%c0_3, %c0_4] : memref<128x128xf32, #tpu.memory_space<vmem>>, vector<128x128xf32>
    %cst_5 = arith.constant dense<0.000000e+00> : vector<8x128xf32>
    %5 = tpu.matmul %3, %4, %cst_5 {dimension_numbers = #tpu.dot_dimension_numbers<[1], [0], [0], [1], [0, 0, 1, 1], [], []>} : vector<8x128xf32>, vector<128x128xf32>, vector<8x128xf32> -> vector<8x128xf32>
    %c0_6 = arith.constant 0 : index
    %c0_7 = arith.constant 0 : index
    %6 = vector.load %arg3[%c0_6, %c0_7] : memref<1x128xf32, #tpu.memory_space<vmem>>, vector<1x128xf32>
    %7 = vector.broadcast %6 : vector<1x128xf32> to vector<8x128xf32>
    %8 = arith.addf %5, %7 : vector<8x128xf32>
    %c0_8 = arith.constant 0 : index
    %c0_9 = arith.constant 0 : index
    %9 = vector.load %arg4[%c0_8, %c0_9] : memref<128x128xf32, #tpu.memory_space<vmem>>, vector<128x128xf32>
    %cst_10 = arith.constant dense<0.000000e+00> : vector<8x128xf32>
    %10 = tpu.matmul %8, %9, %cst_10 {dimension_numbers = #tpu.dot_dimension_numbers<[1], [0], [0], [1], [0, 0, 1, 1], [], []>} : vector<8x128xf32>, vector<128x128xf32>, vector<8x128xf32> -> vector<8x128xf32>
    %c0_11 = arith.constant 0 : index
    %c0_12 = arith.constant 0 : index
    %11 = vector.load %arg5[%c0_11, %c0_12] : memref<1x128xf32, #tpu.memory_space<vmem>>, vector<1x128xf32>
    %12 = vector.broadcast %11 : vector<1x128xf32> to vector<8x128xf32>
    %13 = arith.addf %10, %12 : vector<8x128xf32>
    %c0_13 = arith.constant 0 : index
    %c0_14 = arith.constant 0 : index
    %14 = vector.load %arg6[%c0_13, %c0_14] : memref<128x128xf32, #tpu.memory_space<vmem>>, vector<128x128xf32>
    %cst_15 = arith.constant dense<0.000000e+00> : vector<8x128xf32>
    %15 = tpu.matmul %13, %14, %cst_15 {dimension_numbers = #tpu.dot_dimension_numbers<[1], [0], [0], [1], [0, 0, 1, 1], [], []>} : vector<8x128xf32>, vector<128x128xf32>, vector<8x128xf32> -> vector<8x128xf32>
    %c0_16 = arith.constant 0 : index
    %c0_17 = arith.constant 0 : index
    %16 = vector.load %arg7[%c0_16, %c0_17] : memref<1x128xf32, #tpu.memory_space<vmem>>, vector<1x128xf32>
    %17 = vector.broadcast %16 : vector<1x128xf32> to vector<8x128xf32>
    %18 = arith.addf %15, %17 : vector<8x128xf32>
    %cst_18 = arith.constant 0.000000e+00 : f32
    %19 = vector.broadcast %cst_18 : f32 to vector<8x128xf32>
    %20 = arith.maximumf %18, %19 : vector<8x128xf32>
    %c0_19 = arith.constant 0 : index
    %c0_20 = arith.constant 0 : index
    %21 = vector.load %arg8[%c0_19, %c0_20] : memref<128x128xf32, #tpu.memory_space<vmem>>, vector<128x128xf32>
    %cst_21 = arith.constant dense<0.000000e+00> : vector<8x128xf32>
    %22 = tpu.matmul %20, %21, %cst_21 {dimension_numbers = #tpu.dot_dimension_numbers<[1], [0], [0], [1], [0, 0, 1, 1], [], []>} : vector<8x128xf32>, vector<128x128xf32>, vector<8x128xf32> -> vector<8x128xf32>
    %c0_22 = arith.constant 0 : index
    %c0_23 = arith.constant 0 : index
    %23 = vector.load %arg9[%c0_22, %c0_23] : memref<1x128xf32, #tpu.memory_space<vmem>>, vector<1x128xf32>
    %24 = vector.broadcast %23 : vector<1x128xf32> to vector<8x128xf32>
    %25 = arith.addf %22, %24 : vector<8x128xf32>
    %c0_24 = arith.constant 0 : index
    %c0_25 = arith.constant 0 : index
    %26 = vector.load %arg10[%c0_24, %c0_25] : memref<128x128xf32, #tpu.memory_space<vmem>>, vector<128x128xf32>
    %cst_26 = arith.constant dense<0.000000e+00> : vector<8x128xf32>
    %27 = tpu.matmul %25, %26, %cst_26 {dimension_numbers = #tpu.dot_dimension_numbers<[1], [0], [0], [1], [0, 0, 1, 1], [], []>} : vector<8x128xf32>, vector<128x128xf32>, vector<8x128xf32> -> vector<8x128xf32>
    %c0_27 = arith.constant 0 : index
    %c0_28 = arith.constant 0 : index
    %28 = vector.load %arg11[%c0_27, %c0_28] : memref<1x128xf32, #tpu.memory_space<vmem>>, vector<1x128xf32>
    %29 = vector.broadcast %28 : vector<1x128xf32> to vector<8x128xf32>
    %30 = arith.addf %27, %29 : vector<8x128xf32>
    %c0_29 = arith.constant 0 : index
    %c0_30 = arith.constant 0 : index
    %31 = vector.load %arg12[%c0_29, %c0_30] : memref<8x128xf32, #tpu.memory_space<vmem>>, vector<8x128xf32>
    tpu.vector_store %arg12[%c0_29, %c0_30], %30 {strides = array<i32>} : memref<8x128xf32, #tpu.memory_space<vmem>>, vector<8x128xf32>,
    return
  }
  func.func @transform_0(%arg0: i32) -> (i32, i32, i32) {
    %c0_i32 = arith.constant 0 : i32
    %c0_i32_0 = arith.constant 0 : i32
    %c0_i32_1 = arith.constant 0 : i32
    return %arg0, %c0_i32, %c0_i32_0 : i32, i32, i32
  }
  func.func @transform_1(%arg0: i32) -> (i32, i32) {
    %c0_i32 = arith.constant 0 : i32
    %c0_i32_0 = arith.constant 0 : i32
    %c0_i32_1 = arith.constant 0 : i32
    return %c0_i32, %c0_i32_0 : i32, i32
  }
  func.func @transform_2(%arg0: i32) -> (i32, i32) {
    %c0_i32 = arith.constant 0 : i32
    %c0_i32_0 = arith.constant 0 : i32
    %c0_i32_1 = arith.constant 0 : i32
    return %c0_i32, %c0_i32_0 : i32, i32
  }
  func.func @transform_3(%arg0: i32) -> (i32, i32) {
    %c0_i32 = arith.constant 0 : i32
    %c0_i32_0 = arith.constant 0 : i32
    %c0_i32_1 = arith.constant 0 : i32
    return %c0_i32, %c0_i32_0 : i32, i32
  }
  func.func @transform_4(%arg0: i32) -> (i32, i32) {
    %c0_i32 = arith.constant 0 : i32
    %c0_i32_0 = arith.constant 0 : i32
    %c0_i32_1 = arith.constant 0 : i32
    return %c0_i32, %c0_i32_0 : i32, i32
  }
  func.func @transform_5(%arg0: i32) -> (i32, i32) {
    %c0_i32 = arith.constant 0 : i32
    %c0_i32_0 = arith.constant 0 : i32
    %c0_i32_1 = arith.constant 0 : i32
    return %c0_i32, %c0_i32_0 : i32, i32
  }
  func.func @transform_6(%arg0: i32) -> (i32, i32) {
    %c0_i32 = arith.constant 0 : i32
    %c0_i32_0 = arith.constant 0 : i32
    %c0_i32_1 = arith.constant 0 : i32
    return %c0_i32, %c0_i32_0 : i32, i32
  }
  func.func @transform_7(%arg0: i32) -> (i32, i32) {
    %c0_i32 = arith.constant 0 : i32
    %c0_i32_0 = arith.constant 0 : i32
    %c0_i32_1 = arith.constant 0 : i32
    return %c0_i32, %c0_i32_0 : i32, i32
  }
  func.func @transform_8(%arg0: i32) -> (i32, i32) {
    %c0_i32 = arith.constant 0 : i32
    %c0_i32_0 = arith.constant 0 : i32
    %c0_i32_1 = arith.constant 0 : i32
    return %c0_i32, %c0_i32_0 : i32, i32
  }
  func.func @transform_9(%arg0: i32) -> (i32, i32) {
    %c0_i32 = arith.constant 0 : i32
    %c0_i32_0 = arith.constant 0 : i32
    %c0_i32_1 = arith.constant 0 : i32
    return %c0_i32, %c0_i32_0 : i32, i32
  }
  func.func @transform_10(%arg0: i32) -> (i32, i32) {
    %c0_i32 = arith.constant 0 : i32
    %c0_i32_0 = arith.constant 0 : i32
    %c0_i32_1 = arith.constant 0 : i32
    return %c0_i32, %c0_i32_0 : i32, i32
  }
  func.func @transform_11(%arg0: i32) -> (i32, i32) {
    %c0_i32 = arith.constant 0 : i32
    %c0_i32_0 = arith.constant 0 : i32
    return %arg0, %c0_i32 : i32, i32
  }
}

</mosaic_0001>

<bundles_post_ra>
// kernel: tpu_custom_call.1
= control target key start
LH: loop header
LB: loop body
LE: loop exit
PB: predicated region body
PF: predicated region fallthrough
CT: control target
= control target key end

     0   :  { %16 = vsyncpa [#allocation3], 0  ;;  %s759_s0 = inlined_call_operand.hbm [shape: f32[8,8,128], index: 0, kind: input, shape index: {}]   ;;  %s760_s1 = inlined_call_operand.hbm [shape: f32[128,128], index: 1, kind: input, shape index: {}]   ;;  %s761_s2 = inlined_call_operand.vmem [shape: f32[1,128], index: 2, kind: input, shape index: {}]   ;;  %s762_s3 = inlined_call_operand.hbm [shape: f32[128,128], index: 3, kind: input, shape index: {}]   ;;  %s763_s4 = inlined_call_operand.vmem [shape: f32[1,128], index: 4, kind: input, shape index: {}]   ;;  %s764_s5 = inlined_call_operand.hbm [shape: f32[128,128], index: 5, kind: input, shape index: {}]   ;;  %s765_s6 = inlined_call_operand.vmem [shape: f32[1,128], index: 6, kind: input, shape index: {}]   ;;  %s766_s7 = inlined_call_operand.hbm [shape: f32[128,128], index: 7, kind: input, shape index: {}]   ;;  %s767_s8 = inlined_call_operand.vmem [shape: f32[1,128], index: 8, kind: input, shape index: {}]   ;;  %s768_s9 = inlined_call_operand.hbm [shape: f32[128,128], index: 9, kind: input, shape index: {}]   ;;  %s769_s10 = inlined_call_operand.vmem [shape: f32[1,128], index: 10, kind: input, shape index: {}]   ;;  %s770_s11 = inlined_call_operand.hbm [shape: f32[8,128], index: 11, kind: output, shape index: {}]  }
   0x1   :  { %17 = vsyncpa [#allocation6], 0 }
   0x2   :  { %18 = vsyncpa [#allocation9], 0 }
   0x3   :  { %19 = vsyncpa [#allocation12], 0 }
   0x4   :  { %20 = vsyncpa [#allocation4], 0  ;;  %s38_s19 = sshll.u32 %s760_s1, 4  ;;  %s634_s20 = smov [#allocation5]   ;;  %s39_s19 = int_to_ptr.hbm [resolvable:$true] %s38_s19 }
   0x5   :  { %s40_s21 = sshll.u32 %s634_s20, 4  ;;  %s68_s24 = sshll.u32 %s764_s5, 4  ;;  %s41_s21 = int_to_ptr.vmem [resolvable:$true] %s40_s21  ;;  %s69_s24 = int_to_ptr.hbm [resolvable:$true] %s68_s24 }
   0x6   :  { %s635_s25 = smov 128   ;;  %s636_s26 = smov 8  }
   0x7   :  { %46 = dma.hbm_to_vmem [thread:$0]  %s39_s19, 2048, %s41_s21, [#allocation6], %s635_s25, %s635_s25, %s636_s26  }
   0x8   :  { %s637_s27 = smov [#allocation8]   ;;  %s25_s1 = sshll.u32 %s759_s0, 4  ;;  %s26_s1 = int_to_ptr.hbm [resolvable:$true] %s25_s1 }
   0x9   :  { %s70_s28 = sshll.u32 %s637_s27, 4  ;;  %s53_s13 = sshll.u32 %s762_s3, 4  ;;  %s71_s28 = int_to_ptr.vmem [resolvable:$true] %s70_s28  ;;  %s54_s13 = int_to_ptr.hbm [resolvable:$true] %s53_s13 }
   0xa   :  { %76 = dma.hbm_to_vmem [thread:$0]  %s69_s24, 2048, %s71_s28, [#allocation9], %s635_s25, %s635_s25, %s636_s26  }
   0xb   :  { %s638_s14 = smov [#allocation2]   ;;  %s639_s16 = smov [#allocation7]  }
   0xc   :  { %s27_s15 = sshll.u32 %s638_s14, 4  ;;  %s55_s0 = sshll.u32 %s639_s16, 4  ;;  %s28_s15 = int_to_ptr.vmem [resolvable:$true] %s27_s15  ;;  %s56_s0 = int_to_ptr.vmem [resolvable:$true] %s55_s0 }
   0xd   :  { %33 = dma.hbm_to_vmem [thread:$0]  %s26_s1, 1024, %s28_s15, [#allocation3], %s635_s25, %s635_s25, %s636_s26  }
   0xe   :  { %s83_s19 = sshll.u32 %s766_s7, 4  ;;  %s98_s21 = sshll.u32 %s768_s9, 4  ;;  %s84_s19 = int_to_ptr.hbm [resolvable:$true] %s83_s19  ;;  %s99_s21 = int_to_ptr.hbm [resolvable:$true] %s98_s21 }
   0xf   :  { %61 = dma.hbm_to_vmem [thread:$0]  %s54_s13, 2048, %s56_s0, [#allocation6], %s635_s25, %s635_s25, %s636_s26  }
  0x10   :  { %s640_s22 = smov [#allocation10]   ;;  %s641_s24 = smov [#allocation11]  }
  0x11   :  { %s85_s23 = sshll.u32 %s640_s22, 4  ;;  %s100_s7 = sshll.u32 %s641_s24, 4  ;;  %s86_s23 = int_to_ptr.vmem [resolvable:$true] %s85_s23  ;;  %s101_s7 = int_to_ptr.vmem [resolvable:$true] %s100_s7 }
  0x12   :  { %91 = dma.hbm_to_vmem [thread:$0]  %s84_s19, 2048, %s86_s23, [#allocation9], %s635_s25, %s635_s25, %s636_s26  }
  0x13   :  { %106 = dma.hbm_to_vmem [thread:$0]  %s99_s21, 2048, %s101_s7, [#allocation12], %s635_s25, %s635_s25, %s636_s26  }
  0x14   :  { %624 = dma.done.wait [#allocation3], 1024  }
  0x15   :  { %625 = vsyncadd [#allocation3], 4294966272 }
  0x16   :  { %626 = dma.done.wait [#allocation6], 4096  }
  0x17   :  { %627 = vsyncadd [#allocation6], 4294963200 }
  0x18   :  { %628 = dma.done.wait [#allocation9], 4096  }
  0x19   :  { %629 = vsyncadd [#allocation9], 4294963200 }
  0x1a   :  { %630 = dma.done.wait [#allocation12], 2048  }
  0x1b   :  { %631 = vsyncadd [#allocation12], 4294965248  ;;  %v212_v0 = vld [vmem:[#allocation5 + $0x78] sm:$0xff]  ;;  %v211_v1 = vld [vmem:[#allocation5 + $0x70] sm:$0xff]  ;;  %vm225_vm0 = vcmask 1041409   ;;  %vm227_vm1 = vcmask 1042434  }
  0x1c   :  { %240 = vmatpush.msra.mxu0 %v212_v0  ;;  %v210_v2 = vld [vmem:[#allocation5 + $0x68] sm:$0xff]  ;;  %v209_v3 = vld [vmem:[#allocation5 + $0x60] sm:$0xff]  ;;  %v208_v4 = vld [vmem:[#allocation5 + $0x58] sm:$0xff]  ;;  %vm229_vm2 = vcmask 1043459   ;;  %vm231_vm3 = vcmask 1044484   ;;  %vm233_vm4 = vcmask 1045509  }
  0x1d   :  { %v133_v5 = vld [vmem:[#allocation2] sm:$0xff]  ;;  %v134_v6 = vld [vmem:[#allocation2 + $0x8] sm:$0xff]  ;;  %v135_v7 = vld [vmem:[#allocation2 + $0x10] sm:$0xff]  ;;  %vm235_vm5 = vcmask 1046534   ;;  %vm237_vm6 = vcmask 1047559   ;;  %s642_s1 = smov [#allocation13]  }
  0x1e   :  { %241 = vmatpush.msra.mxu0 %v211_v1  ;;  %v136_v8 = vld [vmem:[#allocation2 + $0x18] sm:$0xff]  ;;  %v137_v9 = vld [vmem:[#allocation2 + $0x20] sm:$0xff]  ;;  %v141_v10 = vrot.slane %v133_v5, 4  ;;  %v147_v11 = vrot.slane %v134_v6, 4  ;;  %v138_v12 = vld [vmem:[#allocation2 + $0x28] sm:$0xff]  ;;  %v153_v15 = vrot.slane %v135_v7, 4 }
  0x1f   :  { %v139_v13 = vld [vmem:[#allocation2 + $0x30] sm:$0xff]  ;;  %v140_v14 = vld [vmem:[#allocation2 + $0x38] sm:$0xff]  ;;  %v159_v16 = vrot.slane %v136_v8, 4  ;;  %v165_v17 = vrot.slane %v137_v9, 4  ;;  %v171_v21 = vrot.slane %v138_v12, 4  ;;  %v206_v29 = vld [vmem:[#allocation5 + $0x48] sm:$0xff] }
  0x20   :  { %242 = vmatpush.msra.mxu0 %v210_v2  ;;  %v207_v18 = vld [vmem:[#allocation5 + $0x50] sm:$0xff]  ;;  %v142_v19 = vadd.f32 %v141_v10, %v133_v5  ;;  %v148_v20 = vadd.f32 %v147_v11, %v134_v6  ;;  %v177_v22 = vrot.slane %v139_v13, 4  ;;  %v275_v23 = vld [vmem:[#allocation7 + $0x78] sm:$0xff]  ;;  %v154_v25 = vadd.f32 %v153_v15, %v135_v7  ;;  %v273_v34 = vld [vmem:[#allocation7 + $0x68] sm:$0xff]  ;;  %s427_s5 = sshll.u32 %s642_s1, 4  ;;  %s429_s14 = sshll.u32 %s770_s11, 4  ;;  %s428_s5 = int_to_ptr.vmem [resolvable:$true] %s427_s5  ;;  %s430_s14 = int_to_ptr.hbm [resolvable:$true] %s429_s14 }
  0x21   :  { %v274_v24 = vld [vmem:[#allocation7 + $0x70] sm:$0xff]  ;;  %v160_v26 = vadd.f32 %v159_v16, %v136_v8  ;;  %v166_v27 = vadd.f32 %v165_v17, %v137_v9  ;;  %v183_v28 = vrot.slane %v140_v14, 4  ;;  %280 = vmatpush.msra.mxu1 %v275_v23  ;;  %v172_v32 = vadd.f32 %v171_v21, %v138_v12  ;;  %v205_v39 = vld [vmem:[#allocation5 + $0x40] sm:$0xff]  ;;  %v204_v45 = vld [vmem:[#allocation5 + $0x38] sm:$0xff] }
  0x22   :  { %243 = vmatpush.msra.mxu0 %v209_v3  ;;  %v143_v30 = vrot.slane %v142_v19, 2  ;;  %v149_v31 = vrot.slane %v148_v20, 2  ;;  %v178_v33 = vadd.f32 %v177_v22, %v139_v13  ;;  %v155_v35 = vrot.slane %v154_v25, 2  ;;  %v272_v44 = vld [vmem:[#allocation7 + $0x60] sm:$0xff]  ;;  %v271_v50 = vld [vmem:[#allocation7 + $0x58] sm:$0xff]  ;;  %v203_v59 = vld [vmem:[#allocation5 + $0x30] sm:$0xff] }
  0x23   :  { %v161_v36 = vrot.slane %v160_v26, 2  ;;  %v167_v37 = vrot.slane %v166_v27, 2  ;;  %v184_v38 = vadd.f32 %v183_v28, %v140_v14  ;;  %281 = vmatpush.msra.mxu1 %v274_v24  ;;  %v173_v42 = vrot.slane %v172_v32, 2  ;;  %v270_v0 = vld [vmem:[#allocation7 + $0x50] sm:$0xff]  ;;  %v202_v5 = vld [vmem:[#allocation5 + $0x28] sm:$0xff]  ;;  %v201_v14 = vld [vmem:[#allocation5 + $0x20] sm:$0xff] }
  0x24   :  { %244 = vmatpush.msra.mxu0 %v208_v4  ;;  %v144_v40 = vadd.f32 %v143_v30, %v142_v19  ;;  %v150_v41 = vadd.f32 %v149_v31, %v148_v20  ;;  %v179_v43 = vrot.slane %v178_v33, 2  ;;  %v156_v46 = vadd.f32 %v155_v35, %v154_v25  ;;  %v269_v10 = vld [vmem:[#allocation7 + $0x48] sm:$0xff]  ;;  %v268_v17 = vld [vmem:[#allocation7 + $0x40] sm:$0xff]  ;;  %v200_v20 = vld [vmem:[#allocation5 + $0x18] sm:$0xff] }
  0x25   :  { %v162_v47 = vadd.f32 %v161_v36, %v160_v26  ;;  %v168_v48 = vadd.f32 %v167_v37, %v166_v27  ;;  %v185_v49 = vrot.slane %v184_v38, 2  ;;  %282 = vmatpush.msra.mxu1 %v273_v34  ;;  %v174_v53 = vadd.f32 %v173_v42, %v172_v32  ;;  %v267_v23 = vld [vmem:[#allocation7 + $0x38] sm:$0xff]  ;;  %v199_v25 = vld [vmem:[#allocation5 + $0x10] sm:$0xff]  ;;  %v265_v31 = vld [vmem:[#allocation7 + $0x28] sm:$0xff] }
  0x26   :  { %245 = vmatpush.msra.mxu0 %v207_v18  ;;  %v145_v51 = vrot.slane %v144_v40, 1  ;;  %v151_v52 = vrot.slane %v150_v41, 1  ;;  %v180_v54 = vadd.f32 %v179_v43, %v178_v33  ;;  %v157_v55 = vrot.slane %v156_v46, 1  ;;  %v266_v27 = vld [vmem:[#allocation7 + $0x30] sm:$0xff]  ;;  %v197_v32 = vld [vmem:[#allocation5] sm:$0xff]  ;;  %v263_v35 = vld [vmem:[#allocation7 + $0x18] sm:$0xff] }
  0x27   :  { %v163_v56 = vrot.slane %v162_v47, 1  ;;  %v169_v57 = vrot.slane %v168_v48, 1  ;;  %v186_v58 = vadd.f32 %v185_v49, %v184_v38  ;;  %283 = vmatpush.msra.mxu1 %v272_v44  ;;  %v175_v62 = vrot.slane %v174_v53, 1  ;;  %v264_v33 = vld [vmem:[#allocation7 + $0x20] sm:$0xff]  ;;  %v262_v36 = vld [vmem:[#allocation7 + $0x10] sm:$0xff]  ;;  %v261_v37 = vld [vmem:[#allocation7 + $0x8] sm:$0xff] }
  0x28   :  { %246 = vmatpush.msra.mxu0 %v206_v29  ;;  %v146_v60 = vadd.f32 %v145_v51, %v144_v40  ;;  %v152_v61 = vadd.f32 %v151_v52, %v150_v41  ;;  %v181_v63 = vrot.slane %v180_v54, 1  ;;  %v158_v1 = vadd.f32 %v157_v55, %v156_v46  ;;  %v198_v29 = vld [vmem:[#allocation5 + $0x8] sm:$0xff]  ;;  %v260_v38 = vld [vmem:[#allocation7] sm:$0xff]  ;;  %v314_v40 = vld [vmem:[#allocation8 + $0x70] sm:$0xff] }
  0x29   :  { %v164_v2 = vadd.f32 %v163_v56, %v162_v47  ;;  %v170_v3 = vadd.f32 %v169_v57, %v168_v48  ;;  %v187_v4 = vrot.slane %v186_v58, 1  ;;  %284 = vmatpush.msra.mxu1 %v271_v50  ;;  %v176_v6 = vadd.f32 %v175_v62, %v174_v53  ;;  %v313_v41 = vld [vmem:[#allocation8 + $0x68] sm:$0xff]  ;;  %v312_v42 = vld [vmem:[#allocation8 + $0x60] sm:$0xff]  ;;  %v311_v43 = vld [vmem:[#allocation8 + $0x58] sm:$0xff] }
  0x2a   :  { %247 = vmatpush.msra.mxu0 %v205_v39  ;;  %v182_v7 = vadd.f32 %v181_v63, %v180_v54  ;;  %v189_v8 = vmul.f32 0.125, %v146_v60  ;;  %v190_v9 = vmul.f32 0.125, %v152_v61  ;;  %v191_v11 = vmul.f32 0.125, %v158_v1  ;;  %v315_v39 = vld [vmem:[#allocation8 + $0x78] sm:$0xff]  ;;  %v310_v44 = vld [vmem:[#allocation8 + $0x50] sm:$0xff]  ;;  %v308_v46 = vld [vmem:[#allocation8 + $0x40] sm:$0xff] }
  0x2b   :  { %v192_v12 = vmul.f32 0.125, %v164_v2  ;;  %v193_v13 = vmul.f32 0.125, %v170_v3  ;;  %285 = vmatpush.msra.mxu1 %v270_v0  ;;  %v194_v15 = vmul.f32 0.125, %v176_v6  ;;  %v188_v18 = vadd.f32 %v187_v4, %v186_v58  ;;  %320 = vmatpush.msra.mxu2 %v315_v39  ;;  %v307_v47 = vld [vmem:[#allocation8 + $0x38] sm:$0xff]  ;;  %v306_v48 = vld [vmem:[#allocation8 + $0x30] sm:$0xff]  ;;  %v305_v49 = vld [vmem:[#allocation8 + $0x28] sm:$0xff] }
  0x2c   :  { %248 = vmatpush.msra.mxu0 %v204_v45  ;;  %v226_v16 = vsel %vm225_vm0, %v190_v9, %v189_v8  ;;  %v195_v21 = vmul.f32 0.125, %v182_v7  ;;  %v309_v45 = vld [vmem:[#allocation8 + $0x48] sm:$0xff]  ;;  %v304_v50 = vld [vmem:[#allocation8 + $0x20] sm:$0xff]  ;;  %v303_v51 = vld [vmem:[#allocation8 + $0x18] sm:$0xff] }
  0x2d   :  { %v228_v19 = vsel %vm227_vm1, %v191_v11, %v226_v16  ;;  %286 = vmatpush.msra.mxu1 %v269_v10  ;;  %v196_v28 = vmul.f32 0.125, %v188_v18  ;;  %321 = vmatpush.msra.mxu2 %v314_v40  ;;  %v302_v52 = vld [vmem:[#allocation8 + $0x10] sm:$0xff]  ;;  %v451_v53 = vld [vmem:[%s761_s2] ss:$0 sm:$0xff]  ;;  %v301_v56 = vld [vmem:[#allocation8 + $0x8] sm:$0xff] }
  0x2e   :  { %249 = vmatpush.msra.mxu0 %v203_v59  ;;  %v230_v22 = vsel %vm229_vm2, %v192_v12, %v228_v19  ;;  %v300_v57 = vld [vmem:[#allocation8] sm:$0xff]  ;;  %v356_v58 = vld [vmem:[#allocation10 + $0x78] sm:$0xff]  ;;  %v355_v59 = vld [vmem:[#allocation10 + $0x70] sm:$0xff] }
  0x2f   :  { %v232_v24 = vsel %vm231_vm3, %v193_v13, %v230_v22  ;;  %287 = vmatpush.msra.mxu1 %v268_v17  ;;  %322 = vmatpush.msra.mxu2 %v313_v41  ;;  %v354_v60 = vld [vmem:[#allocation10 + $0x68] sm:$0xff]  ;;  %v353_v61 = vld [vmem:[#allocation10 + $0x60] sm:$0xff]  ;;  %v352_v62 = vld [vmem:[#allocation10 + $0x58] sm:$0xff] }
  0x30   :  { %250 = vmatpush.msra.mxu0 %v202_v5  ;;  %v234_v26 = vsel %vm233_vm4, %v194_v15, %v232_v24  ;;  %361 = vmatpush.msra.mxu3 %v356_v58  ;;  %v351_v63 = vld [vmem:[#allocation10 + $0x50] sm:$0xff]  ;;  %v350_v0 = vld [vmem:[#allocation10 + $0x48] sm:$0xff]  ;;  %v349_v1 = vld [vmem:[#allocation10 + $0x40] sm:$0xff] }
  0x31   :  { %288 = vmatpush.msra.mxu1 %v267_v23  ;;  %v236_v30 = vsel %vm235_vm5, %v195_v21, %v234_v26  ;;  %323 = vmatpush.msra.mxu2 %v312_v42  ;;  %v348_v2 = vld [vmem:[#allocation10 + $0x38] sm:$0xff]  ;;  %v347_v3 = vld [vmem:[#allocation10 + $0x30] sm:$0xff]  ;;  %v346_v4 = vld [vmem:[#allocation10 + $0x28] sm:$0xff] }
  0x32   :  { %251 = vmatpush.msra.mxu0 %v201_v14  ;;  %v238_v34 = vsel %vm237_vm6, %v196_v28, %v236_v30  ;;  %362 = vmatpush.msra.mxu3 %v355_v59  ;;  %v345_v5 = vld [vmem:[#allocation10 + $0x20] sm:$0xff]  ;;  %v344_v6 = vld [vmem:[#allocation10 + $0x18] sm:$0xff]  ;;  %v343_v10 = vld [vmem:[#allocation10 + $0x10] sm:$0xff] }
  0x33   :  { %289 = vmatpush.msra.mxu1 %v266_v27  ;;  %324 = vmatpush.msra.mxu2 %v311_v43  ;;  %v452_v7 = vld [vmem:[%s763_s4] ss:$0 sm:$0xff]  ;;  %v342_v11 = vld [vmem:[#allocation10 + $0x8] sm:$0xff]  ;;  %v396_v13 = vld [vmem:[#allocation11 + $0x78] sm:$0xff] }
  0x34   :  { %252 = vmatpush.msra.mxu0 %v200_v20  ;;  %363 = vmatpush.msra.mxu3 %v354_v60  ;;  %v341_v12 = vld [vmem:[#allocation10] sm:$0xff]  ;;  %v395_v14 = vld [vmem:[#allocation11 + $0x70] sm:$0xff]  ;;  %v394_v15 = vld [vmem:[#allocation11 + $0x68] sm:$0xff] }
  0x35   :  { %290 = vmatpush.msra.mxu1 %v265_v31  ;;  %325 = vmatpush.msra.mxu2 %v310_v44  ;;  %v393_v16 = vld [vmem:[#allocation11 + $0x60] sm:$0xff]  ;;  %v392_v17 = vld [vmem:[#allocation11 + $0x58] sm:$0xff]  ;;  %v391_v18 = vld [vmem:[#allocation11 + $0x50] sm:$0xff] }
  0x36   :  { %253 = vmatpush.msra.mxu0 %v199_v25  ;;  %364 = vmatpush.msra.mxu3 %v353_v61  ;;  %v390_v19 = vld [vmem:[#allocation11 + $0x48] sm:$0xff]  ;;  %v389_v20 = vld [vmem:[#allocation11 + $0x40] sm:$0xff]  ;;  %v388_v21 = vld [vmem:[#allocation11 + $0x38] sm:$0xff] }
  0x37   :  { %291 = vmatpush.msra.mxu1 %v264_v33  ;;  %326 = vmatpush.msra.mxu2 %v309_v45  ;;  %v387_v22 = vld [vmem:[#allocation11 + $0x30] sm:$0xff]  ;;  %v386_v23 = vld [vmem:[#allocation11 + $0x28] sm:$0xff]  ;;  %v385_v24 = vld [vmem:[#allocation11 + $0x20] sm:$0xff] }
  0x38   :  { %254 = vmatpush.msra.mxu0 %v198_v29  ;;  %365 = vmatpush.msra.mxu3 %v352_v62  ;;  %v384_v25 = vld [vmem:[#allocation11 + $0x18] sm:$0xff]  ;;  %v453_v26 = vld [vmem:[%s765_s6] ss:$0 sm:$0xff]  ;;  %v383_v27 = vld [vmem:[#allocation11 + $0x10] sm:$0xff] }
  0x39   :  { %292 = vmatpush.msra.mxu1 %v263_v35  ;;  %327 = vmatpush.msra.mxu2 %v308_v46  ;;  %v382_v31 = vld [vmem:[#allocation11 + $0x8] sm:$0xff]  ;;  %v454_v33 = vld [vmem:[%s767_s8] ss:$0 sm:$0xff] }
  0x3a   :  { %255 = vmatpush.msra.mxu0 %v197_v32  ;;  %366 = vmatpush.msra.mxu3 %v351_v63  ;;  %v381_v32 = vld [vmem:[#allocation11] sm:$0xff] }
  0x3b   :  { %256 = vmatmul.f32.vlgmr.msra.gmra.mxu0 %v238_v34  ;;  %293 = vmatpush.msra.mxu1 %v262_v36  ;;  %v455_v36 = vld [vmem:[%s769_s10] ss:$0 sm:$0xff] }
  0x3c   :  { %328 = vmatpush.msra.mxu2 %v307_v47  ;;  %367 = vmatpush.msra.mxu3 %v350_v0 }
  0x3d   :  { %294 = vmatpush.msra.mxu1 %v261_v37  ;;  %401 = vmatpush.msrb.mxu0 %v396_v13 }
  0x3e   :  { %329 = vmatpush.msra.mxu2 %v306_v48  ;;  %368 = vmatpush.msra.mxu3 %v349_v1 }
  0x3f   :  { %295 = vmatpush.msra.mxu1 %v260_v38  ;;  %402 = vmatpush.msrb.mxu0 %v395_v14 }
  0x40   :  { %330 = vmatpush.msra.mxu2 %v305_v49  ;;  %369 = vmatpush.msra.mxu3 %v348_v2 }
  0x41   :  { %403 = vmatpush.msrb.mxu0 %v394_v15 }
  0x42   :  { %331 = vmatpush.msra.mxu2 %v304_v50  ;;  %370 = vmatpush.msra.mxu3 %v347_v3 }
  0x43   :  { %404 = vmatpush.msrb.mxu0 %v393_v16 }
  0x44   :  { %332 = vmatpush.msra.mxu2 %v303_v51  ;;  %371 = vmatpush.msra.mxu3 %v346_v4 }
  0x45   :  { %405 = vmatpush.msrb.mxu0 %v392_v17 }
  0x46   :  { %333 = vmatpush.msra.mxu2 %v302_v52  ;;  %372 = vmatpush.msra.mxu3 %v345_v5 }
  0x47   :  { %406 = vmatpush.msrb.mxu0 %v391_v18 }
  0x48   :  { %334 = vmatpush.msra.mxu2 %v301_v56  ;;  %373 = vmatpush.msra.mxu3 %v344_v6 }
  0x49   :  { %407 = vmatpush.msrb.mxu0 %v390_v19 }
  0x4a   :  { %335 = vmatpush.msra.mxu2 %v300_v57  ;;  %374 = vmatpush.msra.mxu3 %v343_v10 }
  0x4b   :  { %408 = vmatpush.msrb.mxu0 %v389_v20 }
  0x4c   :  { %375 = vmatpush.msra.mxu3 %v342_v11 }
  0x4d   :  { %409 = vmatpush.msrb.mxu0 %v388_v21 }
  0x4e   :  { %376 = vmatpush.msra.mxu3 %v341_v12 }
  0x4f   :  { %410 = vmatpush.msrb.mxu0 %v387_v22 }
  0x51   :  { %411 = vmatpush.msrb.mxu0 %v386_v23 }
  0x53   :  { %412 = vmatpush.msrb.mxu0 %v385_v24 }
  0x55   :  { %413 = vmatpush.msrb.mxu0 %v384_v25 }
  0x57   :  { %414 = vmatpush.msrb.mxu0 %v383_v27 }
  0x59   :  { %415 = vmatpush.msrb.mxu0 %v382_v31 }
  0x5b   :  { %416 = vmatpush.msrb.mxu0 %v381_v32 }
  0xb8   :  { %v257_v54 = vpop.f32.mrf.mxu0 }
  0xb9   :  { %v258_v55 = vadd.f32 %v451_v53, %v257_v54 }
  0xbb   :  { %296 = vmatmul.f32.vlgmr.msra.gmra.mxu1 %v258_v55 }
 0x138   :  { %v297_v8 = vpop.f32.mrf.mxu1 }
 0x139   :  { %v298_v9 = vadd.f32 %v452_v7, %v297_v8 }
 0x13b   :  { %336 = vmatmul.f32.vlgmr.msra.gmra.mxu2 %v298_v9 }
 0x1be   :  { %v337_v28 = vpop.f32.mrf.mxu2 }
 0x1bf   :  { %v338_v29 = vadd.f32 %v453_v26, %v337_v28 }
 0x1c1   :  { %v340_v30 = vmax.f32 %v338_v29, 0.0 }
 0x1c3   :  { %377 = vmatmul.f32.vlgmr.msra.gmra.mxu3 %v340_v30 }
 0x246   :  { %v378_v34 = vpop.f32.mrf.mxu3 }
 0x247   :  { %v379_v35 = vadd.f32 %v454_v33, %v378_v34 }
 0x249   :  { %417 = vmatmul.f32.vlgmr.msrb.gmra.mxu0 %v379_v35 }
 0x2c6   :  { %v418_v37 = vpop.f32.mrf.mxu0 }
 0x2c7   :  { %v419_v38 = vadd.f32 %v455_v36, %v418_v37 }
 0x2c9   :  { %421 = vst [vmem:[#allocation13] sm:$0xff] %v419_v38 }
 0x2ca   :  { %432 = dma.vmem_to_hbm [thread:$0]  %s428_s5, 128, %s430_s14, [#allocation4]  }
 0x2cb   :  { %632 = dma.done.wait [#allocation4], 128  }
 0x2cc   :  { %633 = vsyncadd [#allocation4], 4294967168 }
 0x2cd   :  { %437 = vsyncpa [#allocation3], 1 }
 0x2ce   :  { %438 = vsyncpa [#allocation6], 1 }
 0x2cf   :  { %439 = vsyncpa [#allocation9], 1 }
 0x2d0   :  { %440 = vsyncpa [#allocation12], 1 }
 0x2d1   :  { %441 = vsyncpa [#allocation4], 1 }

</bundles_post_ra>
